<compile_context>
chip_gen: v6e
topology: v6e:2x2x1
jax: 0.10.0
libtpu: 0.0.40
codegen_flags: <defaults>
</compile_context>

<pallas_src>
import jax
import jax.numpy as jnp
from jax.experimental import pallas as pl
from jax.experimental.pallas import tpu as pltpu


def _round_up(x, m):
    return (x + m - 1) // m * m


def _prod(vals):
    r = 1
    for v in vals:
        r *= int(v)
    return r


def _pad_kernel(x_ref, o_ref):
    """x_ref: (c_blk, D_in, *in_sp); o_ref: (c_blk, D_out, *out_sp).

    *in_sp / *out_sp are either (H, W) (pad_W > 0) or (H*W,) (pad_W == 0,
    lane-dense path).  All shapes are static.
    """
    c_blk = o_ref.shape[0]
    d_in, d_out = x_ref.shape[1], o_ref.shape[1]
    in_tail, out_tail = tuple(x_ref.shape[2:]), tuple(o_ref.shape[2:])

    x = x_ref[...]

    # Fuse the lane-axis pad into the interior store: pad columns share vregs
    # with the valid data, so append zeros in-register and store once instead
    # of interior + a second masked strip store per row.
    lane_pad = out_tail[-1] - in_tail[-1]
    if lane_pad > 0:
        x = jnp.concatenate(
            [x, jnp.zeros(x.shape[:-1] + (lane_pad,), o_ref.dtype)], axis=-1)

    if len(out_tail) == 2:
        # (c, D, H, W) blocks: W pad fused above, H pad is a sublane strip.
        h_in, h_out = in_tail[0], out_tail[0]
        o_ref[:, 0:d_in, 0:h_in, :] = x
        if h_out > h_in:
            o_ref[:, 0:d_in, h_in:h_out, :] = jnp.zeros(
                (c_blk, d_in, h_out - h_in, out_tail[1]), o_ref.dtype)
        if d_out > d_in:
            o_ref[:, d_in:d_out, :, :] = jnp.zeros(
                (c_blk, d_out - d_in) + out_tail, o_ref.dtype)
    else:
        # (c, D, H*W) blocks (pad_W == 0): H pad was fused into the lane pad.
        o_ref[:, 0:d_in, :] = x
        if d_out > d_in:
            o_ref[:, d_in:d_out, :] = jnp.zeros(
                (c_blk, d_out - d_in) + out_tail, o_ref.dtype)


def pad_layer(x, pad_dims):
    """Pallas implementation of PadLayer.forward for a 5-D NCDHW input."""
    pd, ph, pw = int(pad_dims[0]), int(pad_dims[1]), int(pad_dims[2])
    if pd + ph + pw == 0:
        return x

    n, c, d_in, h_in, w_in = x.shape
    d_out, h_out, w_out = d_in + pd, h_in + ph, w_in + pw

    # Lane-dense presentation: with no W pad, flatten (H, W) so the lane axis
    # is H*W instead of a tiny masked W (free row-major reshape).
    if pw == 0:
        in_tail, out_tail = (d_in, h_in * w_in), (d_out, h_out * w_in)
        x_k = x.reshape(n, c, d_in, h_in * w_in)
    else:
        in_tail, out_tail = (d_in, h_in, w_in), (d_out, h_out, w_out)
        x_k = x

    itemsize = jnp.dtype(x.dtype).itemsize
    sublane = max(8, 8 * (4 // itemsize))          # 8 / 16 / 32 for 4 / 2 / 1 B
    vmem_cap = 64 * 1024 * 1024                    # conservative (v7x) fallback
    try:
        vmem_cap = int(pltpu.get_tpu_info().vmem_capacity_bytes)
    except Exception:
        pass
    vmem_ceiling = (vmem_cap * 3) // 4             # headroom below physical

    def _tile_bytes(tail):
        *lead, s, l = tail
        return _prod(lead) * _round_up(s, sublane) * _round_up(l, 128) * itemsize

    per_c = _tile_bytes(in_tail) + _tile_bytes(out_tail)

    # Channel blocking: biggest c_blk whose double-buffered in+out footprint
    # fits the budget; keep >= 2 total grid steps when cleanly possible so
    # v7x's two TensorCores both move data (no-op on single-TC v5e/v6e).
    budget = min(32 * 1024 * 1024, vmem_ceiling - (1 << 20))
    divisors = [v for v in range(c, 0, -1) if c % v == 0]
    fitting = [v for v in divisors if 2 * v * per_c <= budget] or [1]
    c_blk = fitting[0]
    if n * (c // c_blk) < 2:
        for v in fitting:
            if n * (c // v) >= 2:
                c_blk = v
                break
    # TODO(synk): also tile the D axis when a single 1-channel block exceeds
    # the VMEM budget; the shapes this module is used with are far below that.

    grid = (n, c // c_blk)
    in_spec = pl.BlockSpec(
        (pl.Squeezed(), c_blk) + in_tail,
        lambda ni, ci: (ni, ci) + (0,) * len(in_tail))
    out_spec = pl.BlockSpec(
        (pl.Squeezed(), c_blk) + out_tail,
        lambda ni, ci: (ni, ci) + (0,) * len(out_tail))

    needed = 2 * c_blk * per_c + (1 << 20)         # default double-buffering
    vmem_limit = int(min(max(needed, 16 * 1024 * 1024), vmem_ceiling))

    out_bytes = n * c * _prod(out_tail) * itemsize
    cost = pl.CostEstimate(
        flops=0, transcendentals=0,
        bytes_accessed=x.size * itemsize + out_bytes)

    out = pl.pallas_call(
        _pad_kernel,
        out_shape=jax.ShapeDtypeStruct((n, c) + out_tail, x.dtype),
        grid_spec=pltpu.PrefetchScalarGridSpec(
            num_scalar_prefetch=0,
            grid=grid,
            in_specs=[in_spec],
            out_specs=out_spec,
        ),
        compiler_params=pltpu.CompilerParams(
            dimension_semantics=("parallel", "parallel"),
            vmem_limit_bytes=vmem_limit,
        ),
        cost_estimate=cost,
    )(x_k)

    return out.reshape(n, c, d_out, h_out, w_out)


if __name__ == "__main__":
    key = jax.random.PRNGKey(0)
    # Small NCDHW input consistent with OpenCell's 3-D conv setting.
    x = jax.random.normal(key, (2, 4, 8, 16, 16), dtype=jnp.float32)

    cases = [
        (2, 3, 5),   # pad all three dims (3-D block path: fused W + H/D strips)
        (0, 0, 3),   # W-only pad (3-D block path, lane-fused pad only)
        (2, 3, 0),   # D+H pad, no W pad (lane-dense flattened path)
        (1, 0, 0),   # D-only pad (flattened path, depth memset only)
    ]
    for pads in cases:
        out = jax.block_until_ready(pad_layer(x, pads))
        ref = jnp.pad(
            x, ((0, 0), (0, 0), (0, pads[0]), (0, pads[1]), (0, pads[2])),
            mode="constant", constant_values=0.0)
        assert out.shape == ref.shape, (pads, out.shape, ref.shape)
        assert bool(jnp.array_equal(out, ref)), f"mismatch for pads={pads}"

    # Zero padding: passthrough (same object, like the PyTorch module).
    assert pad_layer(x, (0, 0, 0)) is x

    print("KERNEL_OK")
</pallas_src>

<mosaic_0001>
module attributes {stable_mosaic.version = 11 : i64} {
  func.func @_pad_kernel(%arg0: i32, %arg1: i32, %arg2: memref<1x4x8x16x16xf32, #tpu.memory_space<vmem>>, %arg3: memref<1x4x10x19x21xf32, #tpu.memory_space<vmem>>) attributes {dimension_semantics = [#tpu.dimension_semantics<parallel>, #tpu.dimension_semantics<parallel>], iteration_bounds = array<i64: 2, 1>, scalar_prefetch = 0 : i64, scratch_operands = 0 : i64, tpu.core_type = #tpu.core_type<tc>, window_params = [{transform_indices = @transform_0, window_bounds = array<i64: 1, 4, 8, 16, 16>}, {transform_indices = @transform_1, window_bounds = array<i64: 1, 4, 10, 19, 21>}]} {
    %c0 = arith.constant 0 : index
    %c0_0 = arith.constant 0 : index
    %c0_1 = arith.constant 0 : index
    %c0_2 = arith.constant 0 : index
    %c0_3 = arith.constant 0 : index
    %0 = vector.load %arg2[%c0, %c0_0, %c0_1, %c0_2, %c0_3] : memref<1x4x8x16x16xf32, #tpu.memory_space<vmem>>, vector<1x4x8x16x16xf32>
    %1 = vector.shape_cast %0 : vector<1x4x8x16x16xf32> to vector<4x8x16x16xf32>
    %cst = arith.constant 0.000000e+00 : f32
    %2 = vector.broadcast %cst : f32 to vector<4x8x16x5xf32>
    %3 = tpu.concatenate %1, %2 in 3 : vector<4x8x16x16xf32>, vector<4x8x16x5xf32> -> vector<4x8x16x21xf32>
    %c0_4 = arith.constant 0 : index
    %c0_5 = arith.constant 0 : index
    %c0_6 = arith.constant 0 : index
    %c0_7 = arith.constant 0 : index
    %c0_8 = arith.constant 0 : index
    %4 = vector.load %arg3[%c0_4, %c0_5, %c0_6, %c0_7, %c0_8] : memref<1x4x10x19x21xf32, #tpu.memory_space<vmem>>, vector<1x4x8x16x21xf32>
    %5 = vector.shape_cast %4 : vector<1x4x8x16x21xf32> to vector<4x8x16x21xf32>
    %6 = vector.shape_cast %3 : vector<4x8x16x21xf32> to vector<1x4x8x16x21xf32>
    tpu.vector_store %arg3[%c0_4, %c0_5, %c0_6, %c0_7, %c0_8], %6 {strides = array<i32>} : memref<1x4x10x19x21xf32, #tpu.memory_space<vmem>>, vector<1x4x8x16x21xf32>,
    %cst_9 = arith.constant 0.000000e+00 : f32
    %7 = vector.broadcast %cst_9 : f32 to vector<4x8x3x21xf32>
    %c0_10 = arith.constant 0 : index
    %c0_11 = arith.constant 0 : index
    %c0_12 = arith.constant 0 : index
    %c16 = arith.constant 16 : index
    %c0_13 = arith.constant 0 : index
    %8 = vector.load %arg3[%c0_10, %c0_11, %c0_12, %c16, %c0_13] : memref<1x4x10x19x21xf32, #tpu.memory_space<vmem>>, vector<1x4x8x3x21xf32>
    %9 = vector.shape_cast %8 : vector<1x4x8x3x21xf32> to vector<4x8x3x21xf32>
    %10 = vector.shape_cast %7 : vector<4x8x3x21xf32> to vector<1x4x8x3x21xf32>
    tpu.vector_store %arg3[%c0_10, %c0_11, %c0_12, %c16, %c0_13], %10 {strides = array<i32>} : memref<1x4x10x19x21xf32, #tpu.memory_space<vmem>>, vector<1x4x8x3x21xf32>,
    %cst_14 = arith.constant 0.000000e+00 : f32
    %11 = vector.broadcast %cst_14 : f32 to vector<4x2x19x21xf32>
    %c0_15 = arith.constant 0 : index
    %c0_16 = arith.constant 0 : index
    %c8 = arith.constant 8 : index
    %c0_17 = arith.constant 0 : index
    %c0_18 = arith.constant 0 : index
    %12 = vector.load %arg3[%c0_15, %c0_16, %c8, %c0_17, %c0_18] : memref<1x4x10x19x21xf32, #tpu.memory_space<vmem>>, vector<1x4x2x19x21xf32>
    %13 = vector.shape_cast %12 : vector<1x4x2x19x21xf32> to vector<4x2x19x21xf32>
    %14 = vector.shape_cast %11 : vector<4x2x19x21xf32> to vector<1x4x2x19x21xf32>
    tpu.vector_store %arg3[%c0_15, %c0_16, %c8, %c0_17, %c0_18], %14 {strides = array<i32>} : memref<1x4x10x19x21xf32, #tpu.memory_space<vmem>>, vector<1x4x2x19x21xf32>,
    return
  }
  func.func @transform_0(%arg0: i32, %arg1: i32) -> (i32, i32, i32, i32, i32) {
    %c0_i32 = arith.constant 0 : i32
    %c0_i32_0 = arith.constant 0 : i32
    %c0_i32_1 = arith.constant 0 : i32
    %c0_i32_2 = arith.constant 0 : i32
    return %arg0, %arg1, %c0_i32, %c0_i32_0, %c0_i32_1 : i32, i32, i32, i32, i32
  }
  func.func @transform_1(%arg0: i32, %arg1: i32) -> (i32, i32, i32, i32, i32) {
    %c0_i32 = arith.constant 0 : i32
    %c0_i32_0 = arith.constant 0 : i32
    %c0_i32_1 = arith.constant 0 : i32
    %c0_i32_2 = arith.constant 0 : i32
    return %arg0, %arg1, %c0_i32, %c0_i32_0, %c0_i32_1 : i32, i32, i32, i32, i32
  }
}

</mosaic_0001>

<bundles_post_ra>
// kernel: tpu_custom_call.1
= control target key start
LH: loop header
LB: loop body
LE: loop exit
PB: predicated region body
PF: predicated region fallthrough
CT: control target
= control target key end

     0   :  { %6 = vsyncpa [#allocation3], 0  ;;  %s1179_s0 = inlined_call_operand.hbm [shape: f32[2,4,8,16,16], index: 0, kind: input, shape index: {}]   ;;  %s1180_s1 = inlined_call_operand.vmem [shape: f32[2,4,10,19,21], index: 1, kind: output, shape index: {}]  }
   0x1   :  { %8 = vsyncpa [#allocation3 + $0x1], 0  ;;  %s711_s6 = smov 0   ;;  %s713_s7 = smov 0  }
   0x2   :  { %s715_s8 = smov 0   ;;  %s717_s9 = smov 0  }
   0x3   :  { %s719_s10 = smov 0   ;;  %s721_s11 = smov 0  }
   0x4 LB: > { %s521_s12 = sadd.s32 4294967295, %s695_s11   ;;  %s26_s13 = sadd.s32 1, %s691_s10  ;;  %s695_s11 = sphi %s721_s11, %s14_s11   ;;  %s691_s10 = sphi %s719_s10, %s1188_s10   ;;  %s687_s9 = sphi %s717_s9, %s1187_s9   ;;  %s683_s8 = sphi %s715_s8, %s1186_s8   ;;  %s679_s7 = sphi %s713_s7, %s1185_s7   ;;  %s675_s6 = sphi %s711_s6, %s1184_s6  }
   0x5   : > { %p28_p0 = scmp.ge.s32.totalorder %s26_s13, 2  ;;  %s35_s14 = sadd.s32 1, %s683_s8 }
   0x6   : > { %p42_p1 = scmp.ne.s32.totalorder %s683_s8, %s679_s7  ;;  %p43_p2 = scmp.eq.s32.totalorder %s695_s11, 0 }
   0x7   : > { %s1190_s13 = smov (%p28_p0, %s26_s13), 0  ;;  %p48_p4 = scmp.ne.s32.totalorder %s679_s7, %s675_s6 }
   0x8   : > { %p747_p3 = por %p43_p2, %p42_p1  ;;  %s30_s16 = ssub.s32 %s691_s10, %s1190_s13 }
   0x9   : > { %p49_p5 = scmp.eq.s32.totalorder %s521_s12, 0  ;;  %p33_p6 = scmp.eq.s32.totalorder %s30_s16, 0 }
   0xa   : > { %p565_p8 = scmp.lt.s32.totalorder %s695_s11, 2  ;;  %s100_s19 = sand.u32 1, %s683_s8  }
   0xb   : > { %p754_p7 = por %p49_p5, %p48_p4  ;;  %s557_s20 = sshll.u32 %s691_s10, 13 }
   0xc   : > { %s760_s18 = scalar_select %p33_p6, %s683_s8, %s35_s14  }
   0xd   : > { %s525_s21 = sshll.u32 %s100_s19, 9  ;;  %s113_s24 = scalar_lea.hbm %s1179_s0, %s557_s20 }
   0xe   : > { %s104_s25 = scalar_lea.vmem [#allocation2], %s525_s21  ;;  %p769_p9 = pnand %p565_p8, %p747_p3 }
   0xf   : > { %s114_s26 = sshll.u32 %s104_s25, 4  ;;  %s101_s28 = scalar_lea.sflag [#allocation3], %s100_s19  ;;  %s115_s26 = int_to_ptr.vmem [resolvable:$true] %s114_s26 }
  0x10   : > { %p619_p10 = pneg %p769_p9  ;;  %s630_s29 = scalar_lea.vmem %s115_s26, 8192 }
  0x11   : > { %p631_p11 = scmp.ne.s32.totalorder %s115_s26, %s630_s29  ;;  %s697_s30 = smov [#allocation2]  }
  0x12   : > { %s635_s2 = sshll.u32 %s697_s30, 4  ;;  %s636_s2 = int_to_ptr.vmem [resolvable:$false] %s635_s2 }
  0x13   : > { %p633_p12 = pnand %p631_p11, %p619_p10  ;;  %s637_s3 = scalar_lea.vmem %s636_s2, 16384 }
  0x14   : > { %p638_p0 = scmp.lt.s32.totalorder %s115_s26, %s636_s2  ;;  %p639_p1 = scmp.lt.s32.totalorder %s637_s3, %s630_s29 }
  0x15   : > { %p634_p13 = pneg %p633_p12 }
  0x16   : > { %p640_p2 = por %p639_p1, %p638_p0 }
  0x18   : > { %p641_p3 = pnand %p640_p2, %p634_p13 }
  0x1a   : > { %644 = shalt.err (!%p641_p3)
}
  0x1b   : > { %s698_s4 = smov 128   ;;  %s699_s5 = smov 8  }
  0x1c   : > { %564 = dma.hbm_to_vmem [thread:$0]  (!%p769_p9), %s113_s24, 8192, %s115_s26, %s101_s28, %s698_s4, %s698_s4, %s699_s5  }
  0x1d   : > { %p528_p4 = scmp.ge.s32.totalorder %s695_s11, 1  ;;  %p122_p5 = scmp.lt.s32.totalorder %s695_s11, 3 }
  0x1f   : > { %p123_p6 = pnand %p528_p4, %p122_p5 }
  0x20   : > { %s128_s6 = sand.u32 (!%p123_p6), 1, %s679_s7  }
  0x21   : > { %126 = sbr.rel (%p123_p6) target bundleno = 105 (0x69), region = 24  ;;  %s529_s12 = sshll.u32 (!%p123_p6), %s128_s6, 9 }
  0x22   : > { %s129_s14 = scalar_lea.sflag (!%p123_p6), [#allocation3], %s128_s6  ;;  %s780_s15 = scalar_lea.vmem (!%p123_p6), [#allocation2], %s529_s12 }
  0x26   : > { %670 = dma.done.wait (%p754_p7), %s129_s14, 8192  }
  0x27   : > { %672 = vsyncadd (%p754_p7), %s129_s14, 4294959104  ;;  %p158_p8 = scmp.lt.s32.totalorder %s687_s9, 1  ;;  %vm297_vm0 = vcmask 171008   ;;  %vm362_vm1 = vcmask 165888   ;;  %vm232_vm2 = vcmask 130048   ;;  %v168_v0 = vld [vmem:[%s780_s15] sm:$0xff] }
  0x28   : > { %v169_v1 = vld [vmem:[%s780_s15 + $0x8] sm:$0xff]  ;;  %v170_v2 = vld [vmem:[%s780_s15 + $0x10] sm:$0xff]  ;;  %v700_v3 = vmov 0.0   ;;  %v233_v4 = vsel %vm232_vm2, %v168_v0, 0.0  ;;  %v171_v7 = vld [vmem:[%s780_s15 + $0x18] sm:$0xff] }
  0x29   : > { %s1192_s9 = smov (!%p158_p8, %s687_s9), 1  ;;  %v234_v5 = vsel %vm232_vm2, %v169_v1, 0.0  ;;  %v235_v6 = vsel %vm232_vm2, %v170_v2, 0.0  ;;  %v172_v8 = vld [vmem:[%s780_s15 + $0x20] sm:$0xff]  ;;  %v173_v9 = vld [vmem:[%s780_s15 + $0x28] sm:$0xff]  ;;  %v236_v10 = vsel %vm232_vm2, %v171_v7, 0.0 }
  0x2a   : > { %s558_s16 = smul.u32 960, %s1192_s9  ;;  %v237_v11 = vsel %vm232_vm2, %v172_v8, 0.0  ;;  %v238_v12 = vsel %vm232_vm2, %v173_v9, 0.0  ;;  %v174_v13 = vld [vmem:[%s780_s15 + $0x30] sm:$0xff]  ;;  %v175_v14 = vld [vmem:[%s780_s15 + $0x38] sm:$0xff]  ;;  %v176_v15 = vld [vmem:[%s780_s15 + $0x40] sm:$0xff] }
  0x2b   : > { %v239_v16 = vsel %vm232_vm2, %v174_v13, 0.0  ;;  %v240_v17 = vsel %vm232_vm2, %v175_v14, 0.0  ;;  %v241_v18 = vsel %vm232_vm2, %v176_v15, 0.0  ;;  %v177_v19 = vld [vmem:[%s780_s15 + $0x48] sm:$0xff]  ;;  %v178_v20 = vld [vmem:[%s780_s15 + $0x50] sm:$0xff]  ;;  %v179_v21 = vld [vmem:[%s780_s15 + $0x58] sm:$0xff] }
  0x2c   : > { %s791_s21 = scalar_lea.vmem %s1180_s1, %s558_s16  ;;  %v242_v22 = vsel %vm232_vm2, %v177_v19, 0.0  ;;  %v243_v23 = vsel %vm232_vm2, %v178_v20, 0.0  ;;  %v244_v24 = vsel %vm232_vm2, %v179_v21, 0.0  ;;  %v180_v25 = vld [vmem:[%s780_s15 + $0x60] sm:$0xff]  ;;  %v181_v26 = vld [vmem:[%s780_s15 + $0x68] sm:$0xff]  ;;  %v182_v27 = vld [vmem:[%s780_s15 + $0x70] sm:$0xff] }
  0x2d   : > { %363 = vst.msk [vmem:[%s791_s21 + $0x10] sm:$0x7] %vm362_vm1, %v700_v3  ;;  %364 = vst.msk [vmem:[%s791_s21 + $0x28] sm:$0x7] %vm362_vm1, %v700_v3  ;;  %v245_v28 = vsel %vm232_vm2, %v180_v25, 0.0  ;;  %v246_v29 = vsel %vm232_vm2, %v181_v26, 0.0 }
  0x2e   : > { %365 = vst.msk [vmem:[%s791_s21 + $0x40] sm:$0x7] %vm362_vm1, %v700_v3  ;;  %366 = vst.msk [vmem:[%s791_s21 + $0x58] sm:$0x7] %vm362_vm1, %v700_v3  ;;  %v247_v30 = vsel %vm232_vm2, %v182_v27, 0.0  ;;  %v183_v31 = vld [vmem:[%s780_s15 + $0x78] sm:$0xff] }
  0x2f   : > { %367 = vst.msk [vmem:[%s791_s21 + $0x70] sm:$0x7] %vm362_vm1, %v700_v3  ;;  %368 = vst.msk [vmem:[%s791_s21 + $0x88] sm:$0x7] %vm362_vm1, %v700_v3  ;;  %v184_v32 = vld [vmem:[%s780_s15 + $0x80] sm:$0xff]  ;;  %v185_v33 = vld [vmem:[%s780_s15 + $0x88] sm:$0xff] }
  0x30   : > { %369 = vst.msk [vmem:[%s791_s21 + $0xa0] sm:$0x7] %vm362_vm1, %v700_v3  ;;  %370 = vst.msk [vmem:[%s791_s21 + $0xb8] sm:$0x7] %vm362_vm1, %v700_v3  ;;  %v248_v34 = vsel %vm232_vm2, %v183_v31, 0.0  ;;  %v249_v35 = vsel %vm232_vm2, %v184_v32, 0.0 }
  0x31   : > { %371 = vst.msk [vmem:[%s791_s21 + $0x100] sm:$0x7] %vm362_vm1, %v700_v3  ;;  %372 = vst.msk [vmem:[%s791_s21 + $0x118] sm:$0x7] %vm362_vm1, %v700_v3  ;;  %v250_v36 = vsel %vm232_vm2, %v185_v33, 0.0  ;;  %v186_v37 = vld [vmem:[%s780_s15 + $0x90] sm:$0xff] }
  0x32   : > { %373 = vst.msk [vmem:[%s791_s21 + $0x130] sm:$0x7] %vm362_vm1, %v700_v3  ;;  %374 = vst.msk [vmem:[%s791_s21 + $0x148] sm:$0x7] %vm362_vm1, %v700_v3  ;;  %v187_v38 = vld [vmem:[%s780_s15 + $0x98] sm:$0xff]  ;;  %v188_v39 = vld [vmem:[%s780_s15 + $0xa0] sm:$0xff] }
  0x33   : > { %375 = vst.msk [vmem:[%s791_s21 + $0x160] sm:$0x7] %vm362_vm1, %v700_v3  ;;  %376 = vst.msk [vmem:[%s791_s21 + $0x178] sm:$0x7] %vm362_vm1, %v700_v3  ;;  %v251_v40 = vsel %vm232_vm2, %v186_v37, 0.0  ;;  %v252_v41 = vsel %vm232_vm2, %v187_v38, 0.0 }
  0x34   : > { %377 = vst.msk [vmem:[%s791_s21 + $0x190] sm:$0x7] %vm362_vm1, %v700_v3  ;;  %378 = vst.msk [vmem:[%s791_s21 + $0x1a8] sm:$0x7] %vm362_vm1, %v700_v3  ;;  %v253_v42 = vsel %vm232_vm2, %v188_v39, 0.0  ;;  %v189_v43 = vld [vmem:[%s780_s15 + $0xa8] sm:$0xff] }
  0x35   : > { %379 = vst.msk [vmem:[%s791_s21 + $0x1f0] sm:$0x7] %vm362_vm1, %v700_v3  ;;  %380 = vst.msk [vmem:[%s791_s21 + $0x208] sm:$0x7] %vm362_vm1, %v700_v3  ;;  %v190_v44 = vld [vmem:[%s780_s15 + $0xb0] sm:$0xff]  ;;  %v191_v45 = vld [vmem:[%s780_s15 + $0xb8] sm:$0xff] }
  0x36   : > { %381 = vst.msk [vmem:[%s791_s21 + $0x220] sm:$0x7] %vm362_vm1, %v700_v3  ;;  %382 = vst.msk [vmem:[%s791_s21 + $0x238] sm:$0x7] %vm362_vm1, %v700_v3  ;;  %v254_v46 = vsel %vm232_vm2, %v189_v43, 0.0  ;;  %v255_v47 = vsel %vm232_vm2, %v190_v44, 0.0 }
  0x37   : > { %383 = vst.msk [vmem:[%s791_s21 + $0x250] sm:$0x7] %vm362_vm1, %v700_v3  ;;  %384 = vst.msk [vmem:[%s791_s21 + $0x268] sm:$0x7] %vm362_vm1, %v700_v3  ;;  %v256_v48 = vsel %vm232_vm2, %v191_v45, 0.0  ;;  %v192_v49 = vld [vmem:[%s780_s15 + $0xc0] sm:$0xff] }
  0x38   : > { %385 = vst.msk [vmem:[%s791_s21 + $0x280] sm:$0x7] %vm362_vm1, %v700_v3  ;;  %386 = vst.msk [vmem:[%s791_s21 + $0x298] sm:$0x7] %vm362_vm1, %v700_v3  ;;  %v193_v50 = vld [vmem:[%s780_s15 + $0xc8] sm:$0xff]  ;;  %v194_v51 = vld [vmem:[%s780_s15 + $0xd0] sm:$0xff] }
  0x39   : > { %387 = vst.msk [vmem:[%s791_s21 + $0x2e0] sm:$0x7] %vm362_vm1, %v700_v3  ;;  %388 = vst.msk [vmem:[%s791_s21 + $0x2f8] sm:$0x7] %vm362_vm1, %v700_v3  ;;  %v257_v52 = vsel %vm232_vm2, %v192_v49, 0.0  ;;  %v258_v53 = vsel %vm232_vm2, %v193_v50, 0.0 }
  0x3a   : > { %389 = vst.msk [vmem:[%s791_s21 + $0x310] sm:$0x7] %vm362_vm1, %v700_v3  ;;  %390 = vst.msk [vmem:[%s791_s21 + $0x328] sm:$0x7] %vm362_vm1, %v700_v3  ;;  %v259_v54 = vsel %vm232_vm2, %v194_v51, 0.0  ;;  %v195_v55 = vld [vmem:[%s780_s15 + $0xd8] sm:$0xff] }
  0x3b   : > { %391 = vst.msk [vmem:[%s791_s21 + $0x340] sm:$0x7] %vm362_vm1, %v700_v3  ;;  %392 = vst.msk [vmem:[%s791_s21 + $0x358] sm:$0x7] %vm362_vm1, %v700_v3  ;;  %v196_v56 = vld [vmem:[%s780_s15 + $0xe0] sm:$0xff]  ;;  %v197_v57 = vld [vmem:[%s780_s15 + $0xe8] sm:$0xff] }
  0x3c   : > { %393 = vst.msk [vmem:[%s791_s21 + $0x370] sm:$0x7] %vm362_vm1, %v700_v3  ;;  %394 = vst.msk [vmem:[%s791_s21 + $0x388] sm:$0x7] %vm362_vm1, %v700_v3  ;;  %v260_v58 = vsel %vm232_vm2, %v195_v55, 0.0  ;;  %v261_v59 = vsel %vm232_vm2, %v196_v56, 0.0 }
  0x3d   : > { %531 = vst.msk [vmem:[%s791_s21 + $0xc0] sm:$0xff] %vm297_vm0, %v700_v3  ;;  %532 = vst.msk [vmem:[%s791_s21 + $0xc8] sm:$0xff] %vm297_vm0, %v700_v3  ;;  %v262_v60 = vsel %vm232_vm2, %v197_v57, 0.0  ;;  %v198_v61 = vld [vmem:[%s780_s15 + $0xf0] sm:$0xff]  ;;  %v199_v62 = vld [vmem:[%s780_s15 + $0xf8] sm:$0xff] }
  0x3e   : > { %533 = vst.msk [vmem:[%s791_s21 + $0xd0] sm:$0x7] %vm362_vm1, %v700_v3  ;;  %536 = vst.msk [vmem:[%s791_s21 + $0xe8] sm:$0x7] %vm362_vm1, %v700_v3  ;;  %v200_v63 = vld [vmem:[%s780_s15 + $0x100] sm:$0xff]  ;;  %v263_v0 = vsel %vm232_vm2, %v198_v61, 0.0 }
  0x3f   : > { %534 = vst.msk [vmem:[%s791_s21 + $0xd8] sm:$0xff] %vm297_vm0, %v700_v3  ;;  %535 = vst.msk [vmem:[%s791_s21 + $0xe0] sm:$0xff] %vm297_vm0, %v700_v3  ;;  %v264_v1 = vsel %vm232_vm2, %v199_v62, 0.0  ;;  %v265_v2 = vsel %vm232_vm2, %v200_v63, 0.0  ;;  %v204_v9 = vld [vmem:[%s780_s15 + $0x120] sm:$0xff]  ;;  %v207_v15 = vld [vmem:[%s780_s15 + $0x138] sm:$0xff] }
  0x40   : > { %537 = vst.msk [vmem:[%s791_s21 + $0x1b0] sm:$0xff] %vm297_vm0, %v700_v3  ;;  %538 = vst.msk [vmem:[%s791_s21 + $0x1b8] sm:$0xff] %vm297_vm0, %v700_v3  ;;  %v210_v21 = vld [vmem:[%s780_s15 + $0x150] sm:$0xff]  ;;  %v213_v27 = vld [vmem:[%s780_s15 + $0x168] sm:$0xff] }
  0x41   : > { %539 = vst.msk [vmem:[%s791_s21 + $0x1c0] sm:$0x7] %vm362_vm1, %v700_v3  ;;  %542 = vst.msk [vmem:[%s791_s21 + $0x1d8] sm:$0x7] %vm362_vm1, %v700_v3  ;;  %v216_v33 = vld [vmem:[%s780_s15 + $0x180] sm:$0xff]  ;;  %v219_v39 = vld [vmem:[%s780_s15 + $0x198] sm:$0xff] }
  0x42   : > { %540 = vst.msk [vmem:[%s791_s21 + $0x1c8] sm:$0xff] %vm297_vm0, %v700_v3  ;;  %541 = vst.msk [vmem:[%s791_s21 + $0x1d0] sm:$0xff] %vm297_vm0, %v700_v3  ;;  %v222_v45 = vld [vmem:[%s780_s15 + $0x1b0] sm:$0xff]  ;;  %v225_v51 = vld [vmem:[%s780_s15 + $0x1c8] sm:$0xff] }
  0x43   : > { %543 = vst.msk [vmem:[%s791_s21 + $0x2a0] sm:$0xff] %vm297_vm0, %v700_v3  ;;  %544 = vst.msk [vmem:[%s791_s21 + $0x2a8] sm:$0xff] %vm297_vm0, %v700_v3  ;;  %v228_v57 = vld [vmem:[%s780_s15 + $0x1e0] sm:$0xff]  ;;  %v231_v63 = vld [vmem:[%s780_s15 + $0x1f8] sm:$0xff] }
  0x44   : > { %545 = vst.msk [vmem:[%s791_s21 + $0x2b0] sm:$0x7] %vm362_vm1, %v700_v3  ;;  %548 = vst.msk [vmem:[%s791_s21 + $0x2c8] sm:$0x7] %vm362_vm1, %v700_v3 }
  0x45   : > { %546 = vst.msk [vmem:[%s791_s21 + $0x2b8] sm:$0xff] %vm297_vm0, %v700_v3  ;;  %547 = vst.msk [vmem:[%s791_s21 + $0x2c0] sm:$0xff] %vm297_vm0, %v700_v3 }
  0x46   : > { %549 = vst.msk [vmem:[%s791_s21 + $0x390] sm:$0xff] %vm297_vm0, %v700_v3  ;;  %550 = vst.msk [vmem:[%s791_s21 + $0x398] sm:$0xff] %vm297_vm0, %v700_v3 }
  0x47   : > { %551 = vst.msk [vmem:[%s791_s21 + $0x3a0] sm:$0x7] %vm362_vm1, %v700_v3  ;;  %554 = vst.msk [vmem:[%s791_s21 + $0x3b8] sm:$0x7] %vm362_vm1, %v700_v3 }
  0x48   : > { %552 = vst.msk [vmem:[%s791_s21 + $0x3a8] sm:$0xff] %vm297_vm0, %v700_v3  ;;  %553 = vst.msk [vmem:[%s791_s21 + $0x3b0] sm:$0xff] %vm297_vm0, %v700_v3  ;;  %v201_v3 = vld [vmem:[%s780_s15 + $0x108] sm:$0xff] }
  0x49   : > { %298 = vst.msk [vmem:[%s791_s21] sm:$0xff] %vm297_vm0, %v233_v4  ;;  %299 = vst.msk [vmem:[%s791_s21 + $0x8] sm:$0xff] %vm297_vm0, %v234_v5  ;;  %v202_v4 = vld [vmem:[%s780_s15 + $0x110] sm:$0xff]  ;;  %v203_v5 = vld [vmem:[%s780_s15 + $0x118] sm:$0xff] }
  0x4a   : > { %300 = vst.msk [vmem:[%s791_s21 + $0x18] sm:$0xff] %vm297_vm0, %v235_v6  ;;  %301 = vst.msk [vmem:[%s791_s21 + $0x20] sm:$0xff] %vm297_vm0, %v236_v10  ;;  %v266_v6 = vsel %vm232_vm2, %v201_v3, 0.0  ;;  %v267_v7 = vsel %vm232_vm2, %v202_v4, 0.0  ;;  %v268_v8 = vsel %vm232_vm2, %v203_v5, 0.0  ;;  %v205_v10 = vld [vmem:[%s780_s15 + $0x128] sm:$0xff] }
  0x4b   : > { %302 = vst.msk [vmem:[%s791_s21 + $0x30] sm:$0xff] %vm297_vm0, %v237_v11  ;;  %303 = vst.msk [vmem:[%s791_s21 + $0x38] sm:$0xff] %vm297_vm0, %v238_v12  ;;  %v206_v11 = vld [vmem:[%s780_s15 + $0x130] sm:$0xff]  ;;  %v269_v12 = vsel %vm232_vm2, %v204_v9, 0.0  ;;  %v270_v13 = vsel %vm232_vm2, %v205_v10, 0.0 }
  0x4c   : > { %304 = vst.msk [vmem:[%s791_s21 + $0x48] sm:$0xff] %vm297_vm0, %v239_v16  ;;  %305 = vst.msk [vmem:[%s791_s21 + $0x50] sm:$0xff] %vm297_vm0, %v240_v17  ;;  %v271_v14 = vsel %vm232_vm2, %v206_v11, 0.0  ;;  %v208_v16 = vld [vmem:[%s780_s15 + $0x140] sm:$0xff]  ;;  %v209_v17 = vld [vmem:[%s780_s15 + $0x148] sm:$0xff] }
  0x4d   : > { %306 = vst.msk [vmem:[%s791_s21 + $0x60] sm:$0xff] %vm297_vm0, %v241_v18  ;;  %307 = vst.msk [vmem:[%s791_s21 + $0x68] sm:$0xff] %vm297_vm0, %v242_v22  ;;  %v272_v18 = vsel %vm232_vm2, %v207_v15, 0.0  ;;  %v273_v19 = vsel %vm232_vm2, %v208_v16, 0.0  ;;  %v274_v20 = vsel %vm232_vm2, %v209_v17, 0.0  ;;  %v211_v22 = vld [vmem:[%s780_s15 + $0x158] sm:$0xff] }
  0x4e   : > { %308 = vst.msk [vmem:[%s791_s21 + $0x78] sm:$0xff] %vm297_vm0, %v243_v23  ;;  %309 = vst.msk [vmem:[%s791_s21 + $0x80] sm:$0xff] %vm297_vm0, %v244_v24  ;;  %v212_v23 = vld [vmem:[%s780_s15 + $0x160] sm:$0xff]  ;;  %v275_v24 = vsel %vm232_vm2, %v210_v21, 0.0  ;;  %v276_v25 = vsel %vm232_vm2, %v211_v22, 0.0 }
  0x4f   : > { %310 = vst.msk [vmem:[%s791_s21 + $0x90] sm:$0xff] %vm297_vm0, %v245_v28  ;;  %311 = vst.msk [vmem:[%s791_s21 + $0x98] sm:$0xff] %vm297_vm0, %v246_v29  ;;  %v277_v26 = vsel %vm232_vm2, %v212_v23, 0.0  ;;  %v214_v28 = vld [vmem:[%s780_s15 + $0x170] sm:$0xff]  ;;  %v215_v29 = vld [vmem:[%s780_s15 + $0x178] sm:$0xff] }
  0x50   : > { %312 = vst.msk [vmem:[%s791_s21 + $0xa8] sm:$0xff] %vm297_vm0, %v247_v30  ;;  %313 = vst.msk [vmem:[%s791_s21 + $0xb0] sm:$0xff] %vm297_vm0, %v248_v34  ;;  %v278_v30 = vsel %vm232_vm2, %v213_v27, 0.0  ;;  %v279_v31 = vsel %vm232_vm2, %v214_v28, 0.0  ;;  %v280_v32 = vsel %vm232_vm2, %v215_v29, 0.0  ;;  %v217_v34 = vld [vmem:[%s780_s15 + $0x188] sm:$0xff] }
  0x51   : > { %314 = vst.msk [vmem:[%s791_s21 + $0xf0] sm:$0xff] %vm297_vm0, %v249_v35  ;;  %315 = vst.msk [vmem:[%s791_s21 + $0xf8] sm:$0xff] %vm297_vm0, %v250_v36  ;;  %v218_v35 = vld [vmem:[%s780_s15 + $0x190] sm:$0xff]  ;;  %v281_v36 = vsel %vm232_vm2, %v216_v33, 0.0  ;;  %v282_v37 = vsel %vm232_vm2, %v217_v34, 0.0 }
  0x52   : > { %316 = vst.msk [vmem:[%s791_s21 + $0x108] sm:$0xff] %vm297_vm0, %v251_v40  ;;  %317 = vst.msk [vmem:[%s791_s21 + $0x110] sm:$0xff] %vm297_vm0, %v252_v41  ;;  %v283_v38 = vsel %vm232_vm2, %v218_v35, 0.0  ;;  %v220_v40 = vld [vmem:[%s780_s15 + $0x1a0] sm:$0xff]  ;;  %v221_v41 = vld [vmem:[%s780_s15 + $0x1a8] sm:$0xff] }
  0x53   : > { %318 = vst.msk [vmem:[%s791_s21 + $0x120] sm:$0xff] %vm297_vm0, %v253_v42  ;;  %319 = vst.msk [vmem:[%s791_s21 + $0x128] sm:$0xff] %vm297_vm0, %v254_v46  ;;  %v284_v42 = vsel %vm232_vm2, %v219_v39, 0.0  ;;  %v285_v43 = vsel %vm232_vm2, %v220_v40, 0.0  ;;  %v286_v44 = vsel %vm232_vm2, %v221_v41, 0.0  ;;  %v223_v46 = vld [vmem:[%s780_s15 + $0x1b8] sm:$0xff] }
  0x54   : > { %320 = vst.msk [vmem:[%s791_s21 + $0x138] sm:$0xff] %vm297_vm0, %v255_v47  ;;  %321 = vst.msk [vmem:[%s791_s21 + $0x140] sm:$0xff] %vm297_vm0, %v256_v48  ;;  %v224_v47 = vld [vmem:[%s780_s15 + $0x1c0] sm:$0xff]  ;;  %v287_v48 = vsel %vm232_vm2, %v222_v45, 0.0  ;;  %v288_v49 = vsel %vm232_vm2, %v223_v46, 0.0 }
  0x55   : > { %322 = vst.msk [vmem:[%s791_s21 + $0x150] sm:$0xff] %vm297_vm0, %v257_v52  ;;  %323 = vst.msk [vmem:[%s791_s21 + $0x158] sm:$0xff] %vm297_vm0, %v258_v53  ;;  %v289_v50 = vsel %vm232_vm2, %v224_v47, 0.0  ;;  %v226_v52 = vld [vmem:[%s780_s15 + $0x1d0] sm:$0xff]  ;;  %v227_v53 = vld [vmem:[%s780_s15 + $0x1d8] sm:$0xff] }
  0x56   : > { %324 = vst.msk [vmem:[%s791_s21 + $0x168] sm:$0xff] %vm297_vm0, %v259_v54  ;;  %325 = vst.msk [vmem:[%s791_s21 + $0x170] sm:$0xff] %vm297_vm0, %v260_v58  ;;  %v290_v54 = vsel %vm232_vm2, %v225_v51, 0.0  ;;  %v291_v55 = vsel %vm232_vm2, %v226_v52, 0.0  ;;  %v292_v56 = vsel %vm232_vm2, %v227_v53, 0.0  ;;  %v229_v58 = vld [vmem:[%s780_s15 + $0x1e8] sm:$0xff] }
  0x57   : > { %326 = vst.msk [vmem:[%s791_s21 + $0x180] sm:$0xff] %vm297_vm0, %v261_v59  ;;  %327 = vst.msk [vmem:[%s791_s21 + $0x188] sm:$0xff] %vm297_vm0, %v262_v60  ;;  %v230_v59 = vld [vmem:[%s780_s15 + $0x1f0] sm:$0xff]  ;;  %v293_v60 = vsel %vm232_vm2, %v228_v57, 0.0  ;;  %v294_v61 = vsel %vm232_vm2, %v229_v58, 0.0 }
  0x58   : > { %328 = vst.msk [vmem:[%s791_s21 + $0x198] sm:$0xff] %vm297_vm0, %v263_v0  ;;  %329 = vst.msk [vmem:[%s791_s21 + $0x1a0] sm:$0xff] %vm297_vm0, %v264_v1  ;;  %v295_v62 = vsel %vm232_vm2, %v230_v59, 0.0  ;;  %v296_v0 = vsel %vm232_vm2, %v231_v63, 0.0 }
  0x59   : > { %330 = vst.msk [vmem:[%s791_s21 + $0x1e0] sm:$0xff] %vm297_vm0, %v265_v2  ;;  %331 = vst.msk [vmem:[%s791_s21 + $0x1e8] sm:$0xff] %vm297_vm0, %v266_v6 }
  0x5a   : > { %332 = vst.msk [vmem:[%s791_s21 + $0x1f8] sm:$0xff] %vm297_vm0, %v267_v7  ;;  %333 = vst.msk [vmem:[%s791_s21 + $0x200] sm:$0xff] %vm297_vm0, %v268_v8 }
  0x5b   : > { %334 = vst.msk [vmem:[%s791_s21 + $0x210] sm:$0xff] %vm297_vm0, %v269_v12  ;;  %335 = vst.msk [vmem:[%s791_s21 + $0x218] sm:$0xff] %vm297_vm0, %v270_v13 }
  0x5c   : > { %336 = vst.msk [vmem:[%s791_s21 + $0x228] sm:$0xff] %vm297_vm0, %v271_v14  ;;  %337 = vst.msk [vmem:[%s791_s21 + $0x230] sm:$0xff] %vm297_vm0, %v272_v18 }
  0x5d   : > { %338 = vst.msk [vmem:[%s791_s21 + $0x240] sm:$0xff] %vm297_vm0, %v273_v19  ;;  %339 = vst.msk [vmem:[%s791_s21 + $0x248] sm:$0xff] %vm297_vm0, %v274_v20 }
  0x5e   : > { %340 = vst.msk [vmem:[%s791_s21 + $0x258] sm:$0xff] %vm297_vm0, %v275_v24  ;;  %341 = vst.msk [vmem:[%s791_s21 + $0x260] sm:$0xff] %vm297_vm0, %v276_v25 }
  0x5f   : > { %342 = vst.msk [vmem:[%s791_s21 + $0x270] sm:$0xff] %vm297_vm0, %v277_v26  ;;  %343 = vst.msk [vmem:[%s791_s21 + $0x278] sm:$0xff] %vm297_vm0, %v278_v30 }
  0x60   : > { %344 = vst.msk [vmem:[%s791_s21 + $0x288] sm:$0xff] %vm297_vm0, %v279_v31  ;;  %345 = vst.msk [vmem:[%s791_s21 + $0x290] sm:$0xff] %vm297_vm0, %v280_v32 }
  0x61   : > { %346 = vst.msk [vmem:[%s791_s21 + $0x2d0] sm:$0xff] %vm297_vm0, %v281_v36  ;;  %347 = vst.msk [vmem:[%s791_s21 + $0x2d8] sm:$0xff] %vm297_vm0, %v282_v37 }
  0x62   : > { %348 = vst.msk [vmem:[%s791_s21 + $0x2e8] sm:$0xff] %vm297_vm0, %v283_v38  ;;  %349 = vst.msk [vmem:[%s791_s21 + $0x2f0] sm:$0xff] %vm297_vm0, %v284_v42 }
  0x63   : > { %350 = vst.msk [vmem:[%s791_s21 + $0x300] sm:$0xff] %vm297_vm0, %v285_v43  ;;  %351 = vst.msk [vmem:[%s791_s21 + $0x308] sm:$0xff] %vm297_vm0, %v286_v44 }
  0x64   : > { %352 = vst.msk [vmem:[%s791_s21 + $0x318] sm:$0xff] %vm297_vm0, %v287_v48  ;;  %353 = vst.msk [vmem:[%s791_s21 + $0x320] sm:$0xff] %vm297_vm0, %v288_v49 }
  0x65   : > { %354 = vst.msk [vmem:[%s791_s21 + $0x330] sm:$0xff] %vm297_vm0, %v289_v50  ;;  %355 = vst.msk [vmem:[%s791_s21 + $0x338] sm:$0xff] %vm297_vm0, %v290_v54 }
  0x66   : > { %356 = vst.msk [vmem:[%s791_s21 + $0x348] sm:$0xff] %vm297_vm0, %v291_v55  ;;  %357 = vst.msk [vmem:[%s791_s21 + $0x350] sm:$0xff] %vm297_vm0, %v292_v56 }
  0x67   : > { %358 = vst.msk [vmem:[%s791_s21 + $0x360] sm:$0xff] %vm297_vm0, %v293_v60  ;;  %359 = vst.msk [vmem:[%s791_s21 + $0x368] sm:$0xff] %vm297_vm0, %v294_v61 }
  0x68   : > { %360 = vst.msk [vmem:[%s791_s21 + $0x378] sm:$0xff] %vm297_vm0, %v295_v62  ;;  %361 = vst.msk [vmem:[%s791_s21 + $0x380] sm:$0xff] %vm297_vm0, %v296_v0 }
  0x69 PF: > { %s14_s11 = sadd.s32 1, %s695_s11   ;;  %s1184_s6 = smov %s679_s7 }
  0x6a   : > { %p11_p7 = scmp.ge.s32.totalorder %s14_s11, 4   ;;  %s1185_s7 = smov %s683_s8 }
  0x6b   : > { %s1186_s8 = smov %s760_s18  ;;  %s1187_s9 = smov %s691_s10 }
  0x6c   : > { %s1188_s10 = smov %s1190_s13  ;;  %13 = sbr.rel (!%p11_p7) target bundleno = 4 (0x4), region = 65 }
  0x71   :  { %452 = vsyncpa [#allocation3], 1 }
  0x72   :  { %454 = vsyncpa [#allocation3 + $0x1], 1 }

</bundles_post_ra>
